<compile_context>
chip_gen: v6e
topology: v6e:2x2x1
jax: 0.10.0
libtpu: 0.0.40
codegen_flags: <defaults>
</compile_context>

<pallas_src>
import math

import jax
import jax.numpy as jnp
from jax.experimental import pallas as pl
from jax.experimental.pallas import tpu as pltpu


def _depconv_kernel(w_ref, b_ref, x_ref, o_ref):
    # w_ref : SMEM (C, K*K)        depthwise taps with BN scale pre-folded
    # b_ref : SMEM (C,)            folded BN bias
    # x_ref : VMEM (1, 1, H+2p, W+2p)  zero-padded plane (one n, one c)
    # o_ref : VMEM (1, 1, H, W)
    H = o_ref.shape[2]
    W = o_ref.shape[3]
    Hp = x_ref.shape[2]
    p = (Hp - H) // 2
    K = 2 * p + 1
    c = pl.program_id(1)

    # Load the padded plane once; the K*K shifted windows below are static
    # value slices of this single load.
    xp = x_ref[0, 0].astype(jnp.float32)              # (H+2p, W+2p), W on lanes

    acc = jnp.zeros((H, W), jnp.float32)
    for kh in range(K):                               # static K*K unroll
        for kw in range(K):
            tap = xp[kh:kh + H, kw:kw + W]            # shifted window
            acc = acc + tap * w_ref[c, kh * K + kw]   # SMEM scalar weight

    y = acc + b_ref[c]                                # folded BN bias
    o_ref[0, 0] = jnp.clip(y, 0.0, 6.0).astype(o_ref.dtype)   # ReLU6


def dep_conv2d(x_nchw, weight_ckk, bn_scale, bn_bias):
    """Depthwise conv (stride=1, pad=K//2, groups=C) + folded BN + ReLU6.

    x_nchw:     (N, C, H, W) float32
    weight_ckk: (C, K, K)    depthwise filters (== PyTorch conv.weight[:, 0])
    bn_scale:   (C,)         gamma / sqrt(running_var + eps)
    bn_bias:    (C,)         beta - running_mean * bn_scale
    returns     (N, C, H, W)
    """
    N, C, H, W = x_nchw.shape
    K = weight_ckk.shape[-1]
    p = K // 2
    Hp, Wp = H + 2 * p, W + 2 * p

    # Fold the BN scale into the depthwise taps (exact for grouped conv); keep
    # only the bias for the in-kernel epilogue.
    w_fold = (weight_ckk * bn_scale[:, None, None]).reshape(C, K * K)
    w_fold = w_fold.astype(jnp.float32)
    bias = bn_bias.astype(jnp.float32)

    # Zero halo for the convolution.  NCHW is kept: no layout transposes.
    x_pad = jnp.pad(x_nchw, ((0, 0), (0, 0), (p, p), (p, p)))

    return pl.pallas_call(
        _depconv_kernel,
        out_shape=jax.ShapeDtypeStruct((N, C, H, W), x_nchw.dtype),
        grid_spec=pltpu.PrefetchScalarGridSpec(
            num_scalar_prefetch=0,
            grid=(N, C),
            in_specs=[
                pl.BlockSpec(memory_space=pltpu.MemorySpace.SMEM),   # taps
                pl.BlockSpec(memory_space=pltpu.MemorySpace.SMEM),   # bias
                pl.BlockSpec((1, 1, Hp, Wp), lambda n, c: (n, c, 0, 0)),
            ],
            out_specs=pl.BlockSpec((1, 1, H, W), lambda n, c: (n, c, 0, 0)),
        ),
        compiler_params=pltpu.CompilerParams(
            dimension_semantics=("parallel", "parallel"),
            vmem_limit_bytes=32 * 1024 * 1024,
        ),
    )(w_fold, bias, x_pad)


def _reference(x_nchw, weight_ckk, bn_scale, bn_bias):
    """Pure-JAX reference (lax depthwise conv) for validation."""
    C, K, _ = weight_ckk.shape
    w_hwio = jnp.transpose(weight_ckk, (1, 2, 0)).reshape(K, K, 1, C)
    x = jnp.transpose(x_nchw, (0, 2, 3, 1))          # NHWC
    y = jax.lax.conv_general_dilated(
        x, w_hwio, window_strides=(1, 1), padding=[(K // 2, K // 2)] * 2,
        dimension_numbers=("NHWC", "HWIO", "NHWC"),
        feature_group_count=C)
    y = y * bn_scale + bn_bias
    y = jnp.clip(y, 0.0, 6.0)
    return jnp.transpose(y, (0, 3, 1, 2))


if __name__ == "__main__":
    # Small shapes consistent with DepConv2d(in_cha=4, out_cha=4, kernel_size=3)
    N, C, H, W, K = 2, 4, 16, 16, 3

    key = jax.random.PRNGKey(0)
    kx, kw_, kg, kb = jax.random.split(key, 4)

    x = jax.random.normal(kx, (N, C, H, W), dtype=jnp.float32)

    # PyTorch-style uniform bound for depthwise conv: fan_in = K*K per channel.
    bound = 1.0 / math.sqrt(K * K)
    conv_w = jax.random.uniform(kw_, (C, K, K), minval=-bound, maxval=bound,
                                dtype=jnp.float32)

    # BatchNorm2d parameters (inference form); running stats at defaults,
    # gamma/beta deterministically perturbed from (1, 0).
    gamma = 1.0 + 0.1 * jax.random.normal(kg, (C,), dtype=jnp.float32)
    beta = 0.1 * jax.random.normal(kb, (C,), dtype=jnp.float32)
    running_mean = jnp.zeros((C,), jnp.float32)
    running_var = jnp.ones((C,), jnp.float32)
    eps = 1e-5
    bn_scale = gamma / jnp.sqrt(running_var + eps)
    bn_bias = beta - running_mean * bn_scale

    out = dep_conv2d(x, conv_w, bn_scale, bn_bias)
    out = jax.block_until_ready(out)

    ref = _reference(x, conv_w, bn_scale, bn_bias)
    assert out.shape == (N, C, H, W)
    assert jnp.allclose(out, ref, atol=1e-5, rtol=1e-5), "mismatch vs reference"

    print("KERNEL_OK")
</pallas_src>

<mosaic_0001>
module attributes {stable_mosaic.version = 11 : i64} {
  func.func @_depconv_kernel(%arg0: i32, %arg1: i32, %arg2: memref<4x9xf32, #tpu.memory_space<smem>>, %arg3: memref<4xf32, #tpu.memory_space<smem>>, %arg4: memref<1x1x18x18xf32, #tpu.memory_space<vmem>>, %arg5: memref<1x1x16x16xf32, #tpu.memory_space<vmem>>) attributes {dimension_semantics = [#tpu.dimension_semantics<parallel>, #tpu.dimension_semantics<parallel>], iteration_bounds = array<i64: 2, 4>, scalar_prefetch = 0 : i64, scratch_operands = 0 : i64, tpu.core_type = #tpu.core_type<tc>, window_params = [{transform_indices = @transform_0, window_bounds = array<i64: 4, 9>}, {transform_indices = @transform_1, window_bounds = array<i64: 4>}, {transform_indices = @transform_2, window_bounds = array<i64: 1, 1, 18, 18>}, {transform_indices = @transform_3, window_bounds = array<i64: 1, 1, 16, 16>}]} {
    %c0 = arith.constant 0 : index
    %c0_0 = arith.constant 0 : index
    %c0_1 = arith.constant 0 : index
    %c0_2 = arith.constant 0 : index
    %0 = vector.load %arg4[%c0, %c0_0, %c0_1, %c0_2] : memref<1x1x18x18xf32, #tpu.memory_space<vmem>>, vector<1x1x18x18xf32>
    %1 = vector.shape_cast %0 : vector<1x1x18x18xf32> to vector<18x18xf32>
    %cst = arith.constant 0.000000e+00 : f32
    %2 = vector.broadcast %cst : f32 to vector<16x16xf32>
    %3 = vector.extract_strided_slice %1 {offsets = [0, 0], sizes = [16, 16], strides = [1, 1]} : vector<18x18xf32> to vector<16x16xf32>
    %4 = arith.index_cast %arg1 : i32 to index
    %c0_3 = arith.constant 0 : index
    %5 = memref.load %arg2[%4, %c0_3] : memref<4x9xf32, #tpu.memory_space<smem>>
    %6 = vector.broadcast %5 : f32 to vector<16x16xf32>
    %7 = arith.mulf %3, %6 : vector<16x16xf32>
    %8 = arith.addf %2, %7 : vector<16x16xf32>
    %9 = vector.extract_strided_slice %1 {offsets = [0, 1], sizes = [16, 16], strides = [1, 1]} : vector<18x18xf32> to vector<16x16xf32>
    %10 = arith.index_cast %arg1 : i32 to index
    %c1 = arith.constant 1 : index
    %11 = memref.load %arg2[%10, %c1] : memref<4x9xf32, #tpu.memory_space<smem>>
    %12 = vector.broadcast %11 : f32 to vector<16x16xf32>
    %13 = arith.mulf %9, %12 : vector<16x16xf32>
    %14 = arith.addf %8, %13 : vector<16x16xf32>
    %15 = vector.extract_strided_slice %1 {offsets = [0, 2], sizes = [16, 16], strides = [1, 1]} : vector<18x18xf32> to vector<16x16xf32>
    %16 = arith.index_cast %arg1 : i32 to index
    %c2 = arith.constant 2 : index
    %17 = memref.load %arg2[%16, %c2] : memref<4x9xf32, #tpu.memory_space<smem>>
    %18 = vector.broadcast %17 : f32 to vector<16x16xf32>
    %19 = arith.mulf %15, %18 : vector<16x16xf32>
    %20 = arith.addf %14, %19 : vector<16x16xf32>
    %21 = vector.extract_strided_slice %1 {offsets = [1, 0], sizes = [16, 16], strides = [1, 1]} : vector<18x18xf32> to vector<16x16xf32>
    %22 = arith.index_cast %arg1 : i32 to index
    %c3 = arith.constant 3 : index
    %23 = memref.load %arg2[%22, %c3] : memref<4x9xf32, #tpu.memory_space<smem>>
    %24 = vector.broadcast %23 : f32 to vector<16x16xf32>
    %25 = arith.mulf %21, %24 : vector<16x16xf32>
    %26 = arith.addf %20, %25 : vector<16x16xf32>
    %27 = vector.extract_strided_slice %1 {offsets = [1, 1], sizes = [16, 16], strides = [1, 1]} : vector<18x18xf32> to vector<16x16xf32>
    %28 = arith.index_cast %arg1 : i32 to index
    %c4 = arith.constant 4 : index
    %29 = memref.load %arg2[%28, %c4] : memref<4x9xf32, #tpu.memory_space<smem>>
    %30 = vector.broadcast %29 : f32 to vector<16x16xf32>
    %31 = arith.mulf %27, %30 : vector<16x16xf32>
    %32 = arith.addf %26, %31 : vector<16x16xf32>
    %33 = vector.extract_strided_slice %1 {offsets = [1, 2], sizes = [16, 16], strides = [1, 1]} : vector<18x18xf32> to vector<16x16xf32>
    %34 = arith.index_cast %arg1 : i32 to index
    %c5 = arith.constant 5 : index
    %35 = memref.load %arg2[%34, %c5] : memref<4x9xf32, #tpu.memory_space<smem>>
    %36 = vector.broadcast %35 : f32 to vector<16x16xf32>
    %37 = arith.mulf %33, %36 : vector<16x16xf32>
    %38 = arith.addf %32, %37 : vector<16x16xf32>
    %39 = vector.extract_strided_slice %1 {offsets = [2, 0], sizes = [16, 16], strides = [1, 1]} : vector<18x18xf32> to vector<16x16xf32>
    %40 = arith.index_cast %arg1 : i32 to index
    %c6 = arith.constant 6 : index
    %41 = memref.load %arg2[%40, %c6] : memref<4x9xf32, #tpu.memory_space<smem>>
    %42 = vector.broadcast %41 : f32 to vector<16x16xf32>
    %43 = arith.mulf %39, %42 : vector<16x16xf32>
    %44 = arith.addf %38, %43 : vector<16x16xf32>
    %45 = vector.extract_strided_slice %1 {offsets = [2, 1], sizes = [16, 16], strides = [1, 1]} : vector<18x18xf32> to vector<16x16xf32>
    %46 = arith.index_cast %arg1 : i32 to index
    %c7 = arith.constant 7 : index
    %47 = memref.load %arg2[%46, %c7] : memref<4x9xf32, #tpu.memory_space<smem>>
    %48 = vector.broadcast %47 : f32 to vector<16x16xf32>
    %49 = arith.mulf %45, %48 : vector<16x16xf32>
    %50 = arith.addf %44, %49 : vector<16x16xf32>
    %51 = vector.extract_strided_slice %1 {offsets = [2, 2], sizes = [16, 16], strides = [1, 1]} : vector<18x18xf32> to vector<16x16xf32>
    %52 = arith.index_cast %arg1 : i32 to index
    %c8 = arith.constant 8 : index
    %53 = memref.load %arg2[%52, %c8] : memref<4x9xf32, #tpu.memory_space<smem>>
    %54 = vector.broadcast %53 : f32 to vector<16x16xf32>
    %55 = arith.mulf %51, %54 : vector<16x16xf32>
    %56 = arith.addf %50, %55 : vector<16x16xf32>
    %57 = arith.index_cast %arg1 : i32 to index
    %58 = memref.load %arg3[%57] : memref<4xf32, #tpu.memory_space<smem>>
    %59 = vector.broadcast %58 : f32 to vector<16x16xf32>
    %60 = arith.addf %56, %59 : vector<16x16xf32>
    %cst_4 = arith.constant 0.000000e+00 : f32
    %cst_5 = arith.constant 6.000000e+00 : f32
    %61 = vector.broadcast %cst_4 : f32 to vector<16x16xf32>
    %62 = arith.maximumf %61, %60 : vector<16x16xf32>
    %63 = vector.broadcast %cst_5 : f32 to vector<16x16xf32>
    %64 = arith.minimumf %63, %62 : vector<16x16xf32>
    %c0_6 = arith.constant 0 : index
    %c0_7 = arith.constant 0 : index
    %c0_8 = arith.constant 0 : index
    %c0_9 = arith.constant 0 : index
    %65 = vector.load %arg5[%c0_6, %c0_7, %c0_8, %c0_9] : memref<1x1x16x16xf32, #tpu.memory_space<vmem>>, vector<1x1x16x16xf32>
    %66 = vector.shape_cast %65 : vector<1x1x16x16xf32> to vector<16x16xf32>
    %67 = vector.shape_cast %64 : vector<16x16xf32> to vector<1x1x16x16xf32>
    tpu.vector_store %arg5[%c0_6, %c0_7, %c0_8, %c0_9], %67 {strides = array<i32>} : memref<1x1x16x16xf32, #tpu.memory_space<vmem>>, vector<1x1x16x16xf32>,
    return
  }
  func.func @transform_0(%arg0: i32, %arg1: i32) -> (i32, i32) {
    %c0_i32 = arith.constant 0 : i32
    %c0_i32_0 = arith.constant 0 : i32
    %c0_i32_1 = arith.constant 0 : i32
    return %c0_i32, %c0_i32_0 : i32, i32
  }
  func.func @transform_1(%arg0: i32, %arg1: i32) -> i32 {
    %c0_i32 = arith.constant 0 : i32
    %c0_i32_0 = arith.constant 0 : i32
    return %c0_i32 : i32
  }
  func.func @transform_2(%arg0: i32, %arg1: i32) -> (i32, i32, i32, i32) {
    %c0_i32 = arith.constant 0 : i32
    %c0_i32_0 = arith.constant 0 : i32
    %c0_i32_1 = arith.constant 0 : i32
    return %arg0, %arg1, %c0_i32, %c0_i32_0 : i32, i32, i32, i32
  }
  func.func @transform_3(%arg0: i32, %arg1: i32) -> (i32, i32, i32, i32) {
    %c0_i32 = arith.constant 0 : i32
    %c0_i32_0 = arith.constant 0 : i32
    %c0_i32_1 = arith.constant 0 : i32
    return %arg0, %arg1, %c0_i32, %c0_i32_0 : i32, i32, i32, i32
  }
}

</mosaic_0001>

<bundles_post_ra>
// kernel: tpu_custom_call.1
= control target key start
LH: loop header
LB: loop body
LE: loop exit
PB: predicated region body
PF: predicated region fallthrough
CT: control target
= control target key end

     0   :  { %s1056_s0 = inlined_call_operand.vmem [shape: f32[4,9], index: 0, kind: input, shape index: {}]   ;;  %s1057_s1 = inlined_call_operand.vmem [shape: f32[4], index: 1, kind: input, shape index: {}]   ;;  %s1058_s2 = inlined_call_operand.vmem [shape: f32[2,4,18,18], index: 2, kind: input, shape index: {}]   ;;  %s1059_s3 = inlined_call_operand.hbm [shape: f32[2,4,16,16], index: 3, kind: output, shape index: {}]  }
   0x1   :  { %1066 = sst [smem:[#allocation13_spill]] %s1056_s0 }
   0x2   :  { %1067 = sst [smem:[#allocation14_spill]] %s1057_s1 }
   0x3   :  { %8 = vsyncpa [#allocation4], 0 }
   0x4   :  { %9 = vsyncpa [#allocation6], 0 }
   0x5   :  { %10 = vsyncpa [#allocation3], 0 }
   0x6   :  { %12 = vsyncpa [#allocation3 + $0x1], 0  ;;  %s799_s12 = smov 0   ;;  %s801_s13 = smov 0  }
   0x7   :  { %s803_s14 = smov 0   ;;  %s805_s15 = smov 0  }
   0x8   :  { %s807_s16 = smov 0   ;;  %s809_s17 = smov 0  }
   0x9   :  { %s811_s18 = smov 0   ;;  %s813_s19 = smov 0  }
   0xa LB: > { %s524_s20 = sadd.s32 4294967295, %s770_s19   ;;  %s525_s21 = sadd.s32 4294967294, %s770_s19   ;;  %s770_s19 = sphi %s813_s19, %s18_s19   ;;  %s766_s18 = sphi %s811_s18, %s1089_s18   ;;  %s762_s17 = sphi %s809_s17, %s1088_s17   ;;  %s758_s16 = sphi %s807_s16, %s1087_s16   ;;  %s754_s15 = sphi %s805_s15, %s1086_s15   ;;  %s750_s14 = sphi %s803_s14, %s1085_s14   ;;  %s746_s13 = sphi %s801_s13, %s1084_s13   ;;  %s742_s12 = sphi %s799_s12, %s1083_s12  }
   0xb   : > { %s27_s22 = sadd.s32 1, %s762_s17  ;;  %s30_s23 = sadd.s32 1, %s766_s18 }
   0xc   : > { %p28_p0 = scmp.ge.s32.totalorder %s27_s22, 4  ;;  %s109_s24 = sadd.s32 1, %s750_s14 }
   0xd   : > { %p119_p1 = scmp.ne.s32.totalorder %s750_s14, %s746_s13  ;;  %p120_p2 = scmp.eq.s32.totalorder %s524_s20, 7 }
   0xe   : > { %s1091_s22 = smov (%p28_p0, %s27_s22), 0  ;;  %s1093_s23 = smov (!%p28_p0, %s30_s23), %s766_s18 }
   0xf   : > { %1068 = sst [smem:[#allocation11_spill]] %s1091_s22  ;;  %s105_s25 = ssub.s32 %s762_s17, %s1091_s22 }
  0x10   : > { %p851_p3 = por %p120_p2, %p119_p1  ;;  %p32_p4 = scmp.ge.s32.totalorder %s1093_s23, 2 }
  0x11   : > { %p125_p5 = scmp.ne.s32.totalorder %s746_s13, %s742_s12  ;;  %p126_p6 = scmp.eq.s32.totalorder %s525_s21, 7 }
  0x12   : > { %s1069_s26 = scalar_select %p851_p3, 1, 0 }
  0x13   : > { %p526_p7 = scmp.ge.s32.totalorder %s770_s19, 1  ;;  %s1095_s23 = smov (%p32_p4, %s1093_s23), 0 }
  0x14   : > { %1070 = sst [smem:[#allocation12_spill]] %s1095_s23  ;;  %p860_p8 = por %p126_p6, %p125_p5 }
  0x15   : > { %p133_p9 = scmp.lt.s32.totalorder %s770_s19, 9  ;;  %s104_s28 = ssub.s32 %s766_s18, %s1095_s23 }
  0x16   : > { %s1071_s27 = scalar_select %p860_p8, 1, 0 }
  0x17   : > { %s106_s29 = sor.u32 %s105_s25, %s104_s28  ;;  %p867_p10 = pnand %p526_p7, %p133_p9 }
  0x18   : > { %p107_p11 = scmp.eq.s32.totalorder %s106_s29, 0  ;;  %p871_p12 = scmp.eq.s32.totalorder %s524_s20, 0 }
  0x19   : > { %s1072_s30 = scalar_select %p867_p10, 1, 0 }
  0x1a   : > { %s1073_s4 = scalar_select %p871_p12, 1, 0 }
  0x1b   : > { %p554_p13 = pneg %p867_p10  ;;  %s1074_s0 = sld [smem:[#allocation13_spill]] }
  0x1c   : > { %s881_s8 = scalar_select %p107_p11, %s750_s14, %s109_s24  }
  0x1d   : > { %p885_p0 = pnand %p871_p12, %p554_p13  ;;  %s1076_s1 = sld [smem:[#allocation14_spill]] }
  0x1f   : > { %p642_p2 = pneg %p885_p0 }
  0x21   : > { %s146_s7 = sshll.u32 %s1074_s0, 4  ;;  %s147_s7 = int_to_ptr.vmem [resolvable:$true] %s146_s7 }
  0x22   : > { %s640_s21 = scalar_lea.vmem %s147_s7, 64  ;;  %p648_p6 = scmp.lt.s32.totalorder %s147_s7, %s147_s7 }
  0x23   : > { %s157_s20 = sshll.u32 %s1076_s1, 4  ;;  %p641_p1 = scmp.ne.s32.totalorder %s147_s7, %s640_s21  ;;  %s158_s20 = int_to_ptr.vmem [resolvable:$true] %s157_s20 }
  0x24   : > { %p649_p7 = scmp.lt.s32.totalorder %s640_s21, %s640_s21 }
  0x25   : > { %p643_p4 = pnand %p642_p2, %p641_p1 }
  0x26   : > { %p650_p9 = por %p649_p7, %p648_p6 }
  0x27   : > { %p644_p5 = pneg %p643_p4 }
  0x29   : > { %p651_p11 = pnand %p650_p9, %p644_p5 }
  0x2b   : > { %654 = shalt.err (!%p651_p11)
}
  0x2c   : > { %s772_s24 = smov [#allocation2]   ;;  %s655_s25 = scalar_lea.vmem %s158_s20, 16 }
  0x2d   : > { %557 = dma.vmem_to_smem (!%p885_p0), %s147_s7, 64, %s772_s24, [#allocation4]  }
  0x2e   : > { %p656_p13 = scmp.ne.s32.totalorder %s158_s20, %s655_s25  ;;  %p663_p12 = scmp.lt.s32.totalorder %s158_s20, %s158_s20 }
  0x2f   : > { %p664_p10 = scmp.lt.s32.totalorder %s655_s25, %s655_s25 }
  0x30   : > { %p658_p8 = pnand %p656_p13, %p642_p2 }
  0x31   : > { %p665_p1 = por %p664_p10, %p663_p12 }
  0x32   : > { %p659_p3 = pneg %p658_p8 }
  0x34   : > { %p666_p4 = pnand %p665_p1, %p659_p3 }
  0x36   : > { %669 = shalt.err (!%p666_p4)
}
  0x37   : > { %s773_s28 = smov [#allocation5]   ;;  %p1077_p5 = scmp.ne.s32.totalorder %s1072_s30, 0 }
  0x38   : > { %560 = dma.vmem_to_smem (!%p885_p0), %s158_s20, 16, %s773_s28, [#allocation6]  }
  0x39   : > { %182 = sbr.rel (%p1077_p5) target bundleno = 240 (0xf0), region = 32  ;;  %p1078_p6 = scmp.ne.s32.totalorder (!%p1077_p5), %s1073_s4, 0 }
  0x3e   : > { %729 = dma.done.wait (%p1078_p6), [#allocation4], 64  }
  0x3f   : > { %731 = vsyncadd (%p1078_p6), [#allocation4], 4294967232 }
  0x40   : > { %733 = dma.done.wait (%p1078_p6), [#allocation6], 16  }
  0x41   : > { %735 = vsyncadd (%p1078_p6), [#allocation6], 4294967280 }
  0x42   : > { %192 = sfence }
  0x43   : > { %p215_p3 = scmp.lt.s32.totalorder %s758_s16, 1  ;;  %p217_p8 = scmp.lt.s32.totalorder %s754_s15, 3  ;;  %vm273_vm0 = vcmask 1046528   ;;  %vm336_vm1 = vcmask 1045504   ;;  %vm398_vm2 = vcmask 130048  }
  0x44   : > { %s911_s29 = sshll.u32 %s754_s15, 7  ;;  %p1079_p12 = scmp.ne.s32.totalorder %s1069_s26, 0 }
  0x45   : > { %s216_s30 = scalar_select %p215_p3, %s758_s16, 1 }
  0x46   : > { %s218_s5 = scalar_select %p217_p8, %s754_s15, 3 }
  0x47   : > { %s543_s6 = smul.u32 12, %s216_s30  ;;  %s249_s4 = sadd.s32 2, %s911_s29 }
  0x48   : > { %s542_s7 = smul.u32 3, %s218_s5  ;;  %s250_s9 = sld [smem:[#allocation2 + %s249_s4]] }
  0x49   : > { %s234_s10 = sadd.s32 1, %s911_s29  ;;  %s283_s24 = sadd.s32 4, %s911_s29 }
  0x4a   : > { %s221_s11 = sadd.s32 %s543_s6, %s542_s7  ;;  %s235_s20 = sld [smem:[#allocation2 + %s234_s10]] }
  0x4b   : > { %s534_s21 = sshll.u32 %s221_s11, 3  ;;  %s284_s1 = sld [smem:[#allocation2 + %s283_s24]] }
  0x4c   : > { %s223_s0 = scalar_lea.vmem %s1058_s2, %s534_s21  ;;  %s305_s23 = sadd.s32 5, %s911_s29 }
  0x4d   : > { %v921_v0 = vld [vmem:[%s223_s0] sm:$0xff]  ;;  %s346_s22 = sadd.s32 7, %s911_s29  ;;  %v925_v1 = vld [vmem:[%s223_s0 + $0x8] sm:$0xff]  ;;  %s306_s30 = sld [smem:[#allocation2 + %s305_s23]]  ;;  %v929_v5 = vld [vmem:[%s223_s0 + $0x10] sm:$0x3] }
  0x4e   : > { %v251_v2 = vstv %s250_s9  ;;  %s368_s5 = sadd.s32 8, %s911_s29  ;;  %s347_s6 = sld [smem:[#allocation2 + %s346_s22]] }
  0x4f   : > { %v252_v3 = vmul.f32 %v251_v2, %v921_v0  ;;  %s369_s4 = sld [smem:[#allocation2 + %s368_s5]]  ;;  %v253_v6 = vmul.f32 %v251_v2, %v925_v1  ;;  %s774_s7 = smov 126  }
  0x50   : > { %v236_v4 = vstv %s235_s20  ;;  %s264_s10 = sadd.s32 3, %s911_s29  ;;  %s327_s9 = sadd.s32 6, %s911_s29 }
  0x51   : > { %256 = vrot.lane.b32.xlu1 %v252_v3, %s774_s7  ;;  %v237_v7 = vmul.f32 %v236_v4, %v921_v0  ;;  %v285_v8 = vstv %s284_s1  ;;  %v238_v9 = vmul.f32 %v236_v4, %v925_v1  ;;  %s775_s23 = smov 127   ;;  %s942_s0 = sld [smem:[#allocation2 + %s911_s29]] }
  0x52   : > { %v287_v10 = vmul.f32 %v285_v8, %v925_v1  ;;  %v288_v11 = vmul.f32 %v285_v8, %v929_v5  ;;  %v286_v12 = vmul.f32 %v285_v8, %v921_v0  ;;  %s944_s22 = sld [smem:[#allocation2 + %s264_s10]]  ;;  %s212_s11 = sand.u32 1, %s746_s13  }
  0x53   : > { %241 = vrot.lane.b32.xlu0 %v237_v7, %s775_s23  ;;  %v307_v13 = vstv %s306_s30  ;;  %s948_s1 = sld [smem:[#allocation2 + %s327_s9]]  ;;  %s533_s20 = sshll.u32 %s212_s11, 4 }
  0x54   : > { %v293_v14 = vrot.slane %v287_v10, 1  ;;  %v295_v15 = vrot.slane %v288_v11, 1  ;;  %v292_v16 = vrot.slane %v286_v12, 1  ;;  %v309_v17 = vmul.f32 %v307_v13, %v925_v1  ;;  %s390_s29 = sld [smem:[#allocation5 + %s754_s15]]  ;;  %s537_s21 = sshll.u32 %s754_s15, 1 }
  0x55   : > { %258 = vrot.lane.b32.xlu1 %v253_v6, %s774_s7  ;;  %v310_v18 = vmul.f32 %v307_v13, %v929_v5  ;;  %v308_v19 = vmul.f32 %v307_v13, %v921_v0  ;;  %v348_v20 = vstv %s347_s6  ;;  %v370_v21 = vstv %s369_s4  ;;  %s538_s24 = sshll.u32 %s758_s16, 3  ;;  %s214_s30 = scalar_lea.vmem [#allocation7], %s533_s20 }
  0x56   : > { %v296_v22 = vsel %vm273_vm0, %v293_v14, %v295_v15  ;;  %v294_v23 = vsel %vm273_vm0, %v292_v16, %v293_v14  ;;  %v315_v24 = vrot.slane %v309_v17, 1  ;;  %v350_v25 = vmul.f32 %v348_v20, %v925_v1  ;;  %s414_s25 = sadd.s32 %s538_s24, %s537_s21  ;;  %s417_s5 = sshll.u32 %s214_s30, 4  ;;  %s1001_s5 = int_to_ptr.vmem [resolvable:$true] %s417_s5 }
  0x57   : > { %243 = vrot.lane.b32.xlu0 %v238_v9, %s775_s23  ;;  %v317_v26 = vrot.slane %v310_v18, 1  ;;  %v314_v27 = vrot.slane %v308_v19, 1  ;;  %v351_v28 = vmul.f32 %v348_v20, %v929_v5  ;;  %v349_v29 = vmul.f32 %v348_v20, %v921_v0  ;;  %s539_s28 = sshll.u32 %s414_s25, 7  ;;  %s1005_s4 = scalar_lea.sflag [#allocation3], %s212_s11 }
  0x58   : > { %v356_v30 = vrot.slane %v350_v25, 2  ;;  %v372_v31 = vmul.f32 %v370_v21, %v925_v1  ;;  %v373_v32 = vmul.f32 %v370_v21, %v929_v5  ;;  %v371_v36 = vmul.f32 %v370_v21, %v921_v0  ;;  %s999_s6 = scalar_lea.hbm %s1059_s3, %s539_s28  ;;  %s776_s10 = smov [#allocation7]  }
  0x59   : > { %299 = vrot.lane.b32.xlu1 %v296_v22, %s775_s23  ;;  %v318_v33 = vsel %vm273_vm0, %v315_v24, %v317_v26  ;;  %v358_v34 = vrot.slane %v351_v28, 2  ;;  %v355_v35 = vrot.slane %v349_v29, 2  ;;  %v229_v37 = vstv %s942_s0  ;;  %s674_s9 = sshll.u32 %s776_s10, 4  ;;  %s675_s9 = int_to_ptr.vmem [resolvable:$false] %s674_s9 }
  0x5a   : > { %v316_v38 = vsel %vm273_vm0, %v314_v27, %v315_v24  ;;  %v378_v39 = vrot.slane %v372_v31, 2  ;;  %v230_v40 = vmul.f32 %v229_v37, %v921_v0  ;;  %v231_v41 = vmul.f32 %v229_v37, %v925_v1  ;;  %p677_p7 = scmp.lt.s32.totalorder %s1001_s5, %s675_s9 }
  0x5b   : > { %297 = vrot.lane.b32.xlu0 %v294_v23, %s775_s23  ;;  %v359_v42 = vsel %vm336_vm1, %v356_v30, %v358_v34  ;;  %v380_v43 = vrot.slane %v373_v32, 2  ;;  %v266_v44 = vstv %s944_s22  ;;  %v329_v45 = vstv %s948_s1 }
  0x5c   : > { %v268_v46 = vmul.f32 %v266_v44, %v925_v1  ;;  %v269_v47 = vmul.f32 %v266_v44, %v929_v5  ;;  %v267_v48 = vmul.f32 %v266_v44, %v921_v0  ;;  %v331_v49 = vmul.f32 %v329_v45, %v925_v1 }
  0x5d   : > { %321 = vrot.lane.b32.xlu1 %v318_v33, %s774_s7  ;;  %v357_v50 = vsel %vm336_vm1, %v355_v35, %v356_v30  ;;  %v377_v51 = vrot.slane %v371_v36, 2  ;;  %v332_v52 = vmul.f32 %v329_v45, %v929_v5  ;;  %v330_v53 = vmul.f32 %v329_v45, %v921_v0 }
  0x5e   : > { %v275_v54 = vrot.slane %v268_v46, 1  ;;  %v277_v55 = vrot.slane %v269_v47, 1  ;;  %v274_v56 = vrot.slane %v267_v48, 1  ;;  %v338_v57 = vrot.slane %v331_v49, 2 }
  0x5f   : > { %319 = vrot.lane.b32.xlu0 %v316_v38, %s774_s7  ;;  %v340_v58 = vrot.slane %v332_v52, 2  ;;  %v337_v59 = vrot.slane %v330_v53, 2  ;;  %v381_v60 = vsel %vm336_vm1, %v378_v39, %v380_v43  ;;  %v379_v1 = vsel %vm336_vm1, %v377_v51, %v378_v39 }
  0x60   : > { %v278_v61 = vsel %vm273_vm0, %v275_v54, %v277_v55  ;;  %v276_v62 = vsel %vm273_vm0, %v274_v56, %v275_v54  ;;  %v391_v25 = vstv %s390_s29 }
  0x61   : > { %362 = vrot.lane.b32.xlu1 %v359_v42, %s775_s23  ;;  %v341_v63 = vsel %vm336_vm1, %v338_v57, %v340_v58  ;;  %v339_v0 = vsel %vm336_vm1, %v337_v59, %v338_v57 }
  0x63   : > { %360 = vrot.lane.b32.xlu0 %v357_v50, %s775_s23  ;;  %s676_s23 = scalar_lea.vmem %s675_s9, 512 }
  0x65   : > { %384 = vrot.lane.b32.xlu1 %v381_v60, %s774_s7 }
  0x67   : > { %382 = vrot.lane.b32.xlu0 %v379_v1, %s774_s7  ;;  %s670_s7 = scalar_lea.vmem %s1001_s5, 256 }
  0x68   : > { %p671_p10 = scmp.ne.s32.totalorder %s1001_s5, %s670_s7  ;;  %p678_p9 = scmp.lt.s32.totalorder %s676_s23, %s670_s7 }
  0x6a   : > { %p672_p0 = pnand %p671_p10, %p1079_p12  ;;  %p679_p11 = por %p678_p9, %p677_p7 }
  0x6c   : > { %p673_p2 = pneg %p672_p0 }
  0x6e   : > { %p680_p13 = pnand %p679_p11, %p673_p2 }
  0xc3   : > { %v257_v2 = vpop.permute.xlu1 %256 }
  0xc5   : > { %v242_v3 = vpop.permute.xlu0 %241 }
  0xc6   : > { %v247_v4 = vadd.f32 %v242_v3, %v230_v40 }
  0xc7   : > { %v259_v5 = vpop.permute.xlu1 %258 }
  0xc8   : > { %v262_v6 = vadd.f32 %v257_v2, %v247_v4 }
  0xc9   : > { %v244_v7 = vpop.permute.xlu0 %243 }
  0xca   : > { %v248_v8 = vadd.f32 %v244_v7, %v231_v41  ;;  %v281_v9 = vadd.f32 %v276_v62, %v262_v6 }
  0xcb   : > { %v300_v10 = vpop.permute.xlu1 %299 }
  0xcc   : > { %v263_v11 = vadd.f32 %v259_v5, %v248_v8 }
  0xcd   : > { %v298_v12 = vpop.permute.xlu0 %297 }
  0xce   : > { %v282_v13 = vadd.f32 %v278_v61, %v263_v11  ;;  %v303_v16 = vadd.f32 %v298_v12, %v281_v9 }
  0xcf   : > { %v322_v14 = vpop.permute.xlu1 %321 }
  0xd0   : > { %v304_v15 = vadd.f32 %v300_v10, %v282_v13 }
  0xd1   : > { %v320_v17 = vpop.permute.xlu0 %319 }
  0xd2   : > { %v326_v18 = vadd.f32 %v322_v14, %v304_v15  ;;  %v325_v19 = vadd.f32 %v320_v17, %v303_v16 }
  0xd3   : > { %v363_v20 = vpop.permute.xlu1 %362 }
  0xd4   : > { %v345_v21 = vadd.f32 %v341_v63, %v326_v18  ;;  %v344_v22 = vadd.f32 %v339_v0, %v325_v19 }
  0xd5   : > { %v361_v23 = vpop.permute.xlu0 %360 }
  0xd6   : > { %v367_v24 = vadd.f32 %v363_v20, %v345_v21  ;;  %v366_v27 = vadd.f32 %v361_v23, %v344_v22 }
  0xd7   : > { %v385_v26 = vpop.permute.xlu1 %384 }
  0xd8   : > { %v389_v28 = vadd.f32 %v385_v26, %v367_v24 }
  0xd9   : > { %v383_v29 = vpop.permute.xlu0 %382 }
  0xda   : > { %v393_v30 = vadd.f32 %v391_v25, %v389_v28  ;;  %v388_v31 = vadd.f32 %v383_v29, %v366_v27 }
  0xdc   : > { %v395_v32 = vmax.f32 %v393_v30, 0.0  ;;  %v392_v33 = vadd.f32 %v391_v25, %v388_v31 }
  0xde   : > { %v397_v34 = vmin.f32 %v395_v32, 6.0  ;;  %v394_v35 = vmax.f32 %v392_v33, 0.0 }
  0xe0   : > { %400 = vst.msk [vmem:[%s214_s30 + $0x8] sm:$0xff] %vm398_vm2, %v397_v34  ;;  %v396_v36 = vmin.f32 %v394_v35, 6.0 }
  0xe2   : > { %399 = vst.msk [vmem:[%s214_s30] sm:$0xff] %vm398_vm2, %v396_v36 }
  0xe3   : > { %683 = shalt.err (!%p680_p13)
}
  0xe4   : > { %s684_s0 = scalar_lea.hbm %s999_s6, 256  ;;  %s688_s29 = scalar_lea.hbm %s1059_s3, 2048 }
  0xe5   : > { %p685_p1 = scmp.ne.s32.totalorder %s999_s6, %s684_s0  ;;  %p689_p6 = scmp.lt.s32.totalorder %s999_s6, %s1059_s3 }
  0xe6   : > { %p690_p3 = scmp.lt.s32.totalorder %s688_s29, %s684_s0 }
  0xe7   : > { %p686_p4 = pnand %p685_p1, %p1079_p12 }
  0xe8   : > { %p691_p8 = por %p690_p3, %p689_p6 }
  0xe9   : > { %p687_p5 = pneg %p686_p4 }
  0xeb   : > { %p692_p10 = pnand %p691_p8, %p687_p5 }
  0xed   : > { %695 = shalt.err (!%p692_p10)
}
  0xee   : > { %s777_s21 = smov 128   ;;  %s778_s24 = smov 8  }
  0xef   : > { %552 = dma.vmem_to_hbm [thread:$0]  (%p1079_p12), %s1001_s5, 256, %s999_s6, %s1005_s4, %s777_s21, %s777_s21, %s778_s24  }
  0xf0 PF: > { %p569_p0 = scmp.ge.s32.totalorder %s770_s19, 2  ;;  %s432_s25 = sand.u32 1, %s742_s12  }
  0xf1   : > { %p1080_p2 = scmp.ne.s32.totalorder %s1071_s27, 0  ;;  %s433_s28 = scalar_lea.sflag [#allocation3], %s432_s25 }
  0xf3   : > { %p562_p7 = pnand %p569_p0, %p1080_p2 }
  0xf5   : > { %p563_p9 = pneg %p562_p7 }
  0xf7   : > { %737 = dma.done.wait (%p563_p9), %s433_s28, 256  }
  0xf8   : > { %739 = vsyncadd (%p563_p9), %s433_s28, 4294967040  ;;  %s18_s19 = sadd.s32 1, %s770_s19   ;;  %s1081_s26 = sld [smem:[#allocation11_spill]] }
  0xf9   : > { %p15_p11 = scmp.ge.s32.totalorder %s18_s19, 10   ;;  %s1082_s30 = sld [smem:[#allocation12_spill]] }
  0xfa   : > { %s1083_s12 = smov %s746_s13  ;;  %s1084_s13 = smov %s750_s14 }
  0xfb   : > { %s1085_s14 = smov %s881_s8  ;;  %s1086_s15 = smov %s762_s17 }
  0xfc   : > { %s1087_s16 = smov %s766_s18  ;;  %17 = sbr.rel (!%p15_p11) target bundleno = 10 (0xa), region = 76 }
  0xfe   : > { %s1088_s17 = smov %s1081_s26 }
  0xff   : > { %s1089_s18 = smov %s1082_s30 }
 0x101   :  { %438 = vsyncpa [#allocation3], 1 }
 0x102   :  { %440 = vsyncpa [#allocation3 + $0x1], 1 }
 0x103   :  { %441 = vsyncpa [#allocation4], 1 }
 0x104   :  { %443 = vsyncpa [#allocation4 + $0x1], 1 }
 0x105   :  { %444 = vsyncpa [#allocation6], 1 }

</bundles_post_ra>
